<compile_context>
chip_gen: v7x
topology: tpu7x:2x2x1
jax: 0.10.0
libtpu: 0.0.40
codegen_flags: <defaults>
</compile_context>

<pallas_src>
import jax
import jax.numpy as jnp
from jax.experimental import pallas as pl
from jax.experimental.pallas import tpu as pltpu

INV_SQRT2 = 0.7071067811865476
EPS = 1e-5                      # nn.InstanceNorm3d default eps
RES_SCALE = 1.0 / 1.414         # ResidualConvBlock residual scale

_COMPILER_PARAMS = pltpu.CompilerParams(
    dimension_semantics=("parallel",),
    vmem_limit_bytes=32 * 1024 * 1024,
)


def _gelu_exact(x):
    # PyTorch nn.GELU() default (approximate='none')
    return 0.5 * x * (1.0 + jax.lax.erf(x * INV_SQRT2))


# ----------------------------- fused conv bodies ------------------------------
def _conv_in_gelu_body(p_ref, w_ref, b_ref):
    """(Cout,K)@(K,S) conv (bf16 MXU, f32 acc) + bias + InstanceNorm over S + GELU."""
    y = jnp.dot(w_ref[...], p_ref[0], preferred_element_type=jnp.float32)  # (Cout, S)
    y = y + b_ref[...]                                     # (Cout, 1) broadcast
    mean = jnp.mean(y, axis=1, keepdims=True)              # per-channel over all voxels
    var = jnp.mean((y - mean) ** 2, axis=1, keepdims=True)  # biased var (PyTorch)
    return _gelu_exact((y - mean) * jax.lax.rsqrt(var + EPS))


def conv_in_gelu_kernel(p_ref, w_ref, b_ref, o_ref):
    # conv1: Conv3d(k=3,p=1) + InstanceNorm3d + GELU, lane-dense (Cout, S) output.
    o_ref[0] = _conv_in_gelu_body(p_ref, w_ref, b_ref).astype(o_ref.dtype)


def conv_res_pool_kernel(p_ref, w_ref, b_ref, res_ref, o_ref):
    # conv2 + InstanceNorm + GELU, then residual, /1.414 and MaxPool3d(2) epilogue.
    x2 = _conv_in_gelu_body(p_ref, w_ref, b_ref)                    # (Cout, S) f32
    r = (res_ref[0].astype(jnp.float32) + x2) * RES_SCALE           # residual / 1.414
    s8 = r.shape[1] // 8
    m = r[:, 0:s8]
    for p in range(1, 8):        # the 8 pool partners are s8 lanes apart (see glue)
        m = jnp.maximum(m, r[:, p * s8:(p + 1) * s8])
    o_ref[0] = m.astype(o_ref.dtype)                                # (Cout, S/8)


# ------------------------------ pallas_call wrappers --------------------------
def conv_in_gelu(patches, w_mat, b_col, out_dtype):
    N, K, S = patches.shape
    Cout = w_mat.shape[0]
    return pl.pallas_call(
        conv_in_gelu_kernel,
        out_shape=jax.ShapeDtypeStruct((N, Cout, S), out_dtype),
        grid=(N,),
        in_specs=[
            pl.BlockSpec((1, K, S), lambda n: (n, 0, 0)),
            pl.BlockSpec((Cout, K), lambda n: (0, 0)),
            pl.BlockSpec((Cout, 1), lambda n: (0, 0)),
        ],
        out_specs=pl.BlockSpec((1, Cout, S), lambda n: (n, 0, 0)),
        compiler_params=_COMPILER_PARAMS,
    )(patches, w_mat, b_col)


def conv_res_pool(patches, w_mat, b_col, residual):
    N, K, S = patches.shape
    Cout = w_mat.shape[0]
    return pl.pallas_call(
        conv_res_pool_kernel,
        out_shape=jax.ShapeDtypeStruct((N, Cout, S // 8), jnp.float32),
        grid=(N,),
        in_specs=[
            pl.BlockSpec((1, K, S), lambda n: (n, 0, 0)),
            pl.BlockSpec((Cout, K), lambda n: (0, 0)),
            pl.BlockSpec((Cout, 1), lambda n: (0, 0)),
            pl.BlockSpec((1, Cout, S), lambda n: (n, 0, 0)),
        ],
        out_specs=pl.BlockSpec((1, Cout, S // 8), lambda n: (n, 0, 0)),
        compiler_params=_COMPILER_PARAMS,
    )(patches, w_mat, b_col, residual)


# --------------------------------- JAX glue -----------------------------------
def im2col_3d(x):
    """(N, C, D, H, W) -> (N, 27*C, D, H, W) 3x3x3 / pad 1 / stride 1 patches.

    K ordering is (c, kd, kh, kw), matching conv_weight.reshape(Cout, -1)."""
    N, C, D, H, W = x.shape
    xp = jnp.pad(x, ((0, 0), (0, 0), (1, 1), (1, 1), (1, 1)))
    cols = []
    for kd in range(3):
        for kh in range(3):
            for kw in range(3):
                cols.append(xp[:, :, kd:kd + D, kh:kh + H, kw:kw + W])
    pat = jnp.stack(cols, axis=2)                    # (N, C, 27, D, H, W)
    return pat.reshape(N, C * 27, D, H, W)


def flatten_pool_order(a):
    """(N, C, D, H, W) -> (N, C, D*H*W) with the flat axis ordered
    (pd, ph, pw, d2, h2, w2): the 8 MaxPool3d(2) partners of every output voxel sit
    exactly D*H*W/8 lanes apart, so the fused kernel pools with static lane slices
    and writes the compact (C, D2*H2*W2) result directly."""
    N, C, D, H, W = a.shape
    a = a.reshape(N, C, D // 2, 2, H // 2, 2, W // 2, 2)
    a = a.transpose(0, 1, 3, 5, 7, 2, 4, 6)          # (N, C, 2, 2, 2, D2, H2, W2)
    return a.reshape(N, C, D * H * W)


def unet_down(x_ncdhw, w1, b1, w2, b2):
    """UnetDown forward.  x: (N, Cin, D, H, W) -> (N, Cout, D//2, H//2, W//2)."""
    N, Cin, D, H, W = x_ncdhw.shape
    Cout = w1.shape[0]
    S = D * H * W
    # MaxPool3d(2) here assumes even spatial dims (always true for UnetDown usage).

    xb = x_ncdhw.astype(jnp.bfloat16)
    wm1 = w1.reshape(Cout, 27 * Cin).astype(jnp.bfloat16)   # (c, kd, kh, kw) K order
    wm2 = w2.reshape(Cout, 27 * Cout).astype(jnp.bfloat16)
    bc1 = b1.reshape(Cout, 1).astype(jnp.float32)
    bc2 = b2.reshape(Cout, 1).astype(jnp.float32)

    # conv1 + InstanceNorm + GELU  ->  bf16 (N, Cout, S) lane-dense intermediate
    p1 = im2col_3d(xb).reshape(N, 27 * Cin, S)
    x1 = conv_in_gelu(p1, wm1, bc1, out_dtype=jnp.bfloat16)
    x1_sp = x1.reshape(N, Cout, D, H, W)

    # ResidualConvBlock: residual source is x if same_channels else x1
    res_sp = xb if Cin == Cout else x1_sp

    # conv2 + InstanceNorm + GELU + residual + /1.414 + MaxPool3d(2), all fused
    p2 = flatten_pool_order(im2col_3d(x1_sp))                # (N, 27*Cout, S)
    res = flatten_pool_order(res_sp)                         # (N, Cout, S)
    pooled = conv_res_pool(p2, wm2, bc2, res)                # (N, Cout, S//8) f32
    return pooled.reshape(N, Cout, D // 2, H // 2, W // 2)   # already NCDHW


# ------------------------------ pure-JAX reference ----------------------------
def unet_down_ref(x, w1, b1, w2, b2):
    def conv(x, w, b):
        y = jax.lax.conv_general_dilated(
            x, w, window_strides=(1, 1, 1), padding="SAME",
            dimension_numbers=("NCDHW", "OIDHW", "NCDHW"),
            precision=jax.lax.Precision.HIGHEST)
        return y + b[None, :, None, None, None]

    def inorm(y):
        mean = jnp.mean(y, axis=(2, 3, 4), keepdims=True)
        var = jnp.mean((y - mean) ** 2, axis=(2, 3, 4), keepdims=True)
        return (y - mean) * jax.lax.rsqrt(var + EPS)

    x1 = _gelu_exact(inorm(conv(x, w1, b1)))
    x2 = _gelu_exact(inorm(conv(x1, w2, b2)))
    res = x if x.shape[1] == x1.shape[1] else x1
    out = (res + x2) / 1.414
    return jax.lax.reduce_window(out, -jnp.inf, jax.lax.max,
                                 (1, 1, 2, 2, 2), (1, 1, 2, 2, 2), "VALID")


if __name__ == "__main__":
    N, Cin, Cout, D, H, W = 2, 4, 8, 8, 8, 8

    key = jax.random.PRNGKey(0)
    k1, k2, k3, k4, k5 = jax.random.split(key, 5)
    # shapes from Conv3d(in, out, 3, 1, 1) / Conv3d(out, out, 3, 1, 1)
    w1 = jax.random.normal(k1, (Cout, Cin, 3, 3, 3), jnp.float32) * 0.1
    b1 = jax.random.normal(k2, (Cout,), jnp.float32) * 0.05
    w2 = jax.random.normal(k3, (Cout, Cout, 3, 3, 3), jnp.float32) * 0.1
    b2 = jax.random.normal(k4, (Cout,), jnp.float32) * 0.05
    x = jax.random.normal(k5, (N, Cin, D, H, W), jnp.float32)

    out = jax.jit(unet_down)(x, w1, b1, w2, b2)
    out = jax.block_until_ready(out)
    assert out.shape == (N, Cout, D // 2, H // 2, W // 2), out.shape

    ref = unet_down_ref(x, w1, b1, w2, b2)
    # bf16 MXU matmuls (DEFAULT precision) + bf16 intermediates give O(1e-2) worst-case
    # deviations vs. the all-f32 HIGHEST-precision reference (the two InstanceNorms
    # rescale the rounding error to the unit-variance activations); allow headroom.
    err = float(jnp.max(jnp.abs(out - ref)))
    assert err < 1e-1, f"max abs err {err}"

    print("KERNEL_OK")
</pallas_src>

<mosaic_0001>
module attributes {stable_mosaic.version = 11 : i64} {
  func.func @conv_in_gelu_kernel(%arg0: i32, %arg1: memref<1x108x512xbf16, #tpu.memory_space<vmem>>, %arg2: memref<8x108xbf16, #tpu.memory_space<vmem>>, %arg3: memref<8x1xf32, #tpu.memory_space<vmem>>, %arg4: memref<1x8x512xbf16, #tpu.memory_space<vmem>>) attributes {dimension_semantics = [#tpu.dimension_semantics<parallel>], iteration_bounds = array<i64: 2>, scalar_prefetch = 0 : i64, scratch_operands = 0 : i64, tpu.core_type = #tpu.core_type<tc>, window_params = [{transform_indices = @transform_0, window_bounds = array<i64: 1, 108, 512>}, {pipeline_mode = #tpu.pipeline_mode<synchronous>, transform_indices = @transform_1, window_bounds = array<i64: 8, 108>}, {pipeline_mode = #tpu.pipeline_mode<synchronous>, transform_indices = @transform_2, window_bounds = array<i64: 8, 1>}, {transform_indices = @transform_3, window_bounds = array<i64: 1, 8, 512>}]} {
    %c0 = arith.constant 0 : index
    %c0_0 = arith.constant 0 : index
    %0 = vector.load %arg2[%c0, %c0_0] : memref<8x108xbf16, #tpu.memory_space<vmem>>, vector<8x108xbf16>
    %c0_1 = arith.constant 0 : index
    %c0_2 = arith.constant 0 : index
    %c0_3 = arith.constant 0 : index
    %1 = vector.load %arg1[%c0_1, %c0_2, %c0_3] : memref<1x108x512xbf16, #tpu.memory_space<vmem>>, vector<1x108x512xbf16>
    %2 = vector.shape_cast %1 : vector<1x108x512xbf16> to vector<108x512xbf16>
    %cst = arith.constant dense<0.000000e+00> : vector<8x512xf32>
    %3 = tpu.matmul %0, %2, %cst {dimension_numbers = #tpu.dot_dimension_numbers<[1], [0], [0], [1], [0, 0, 1, 1], [], []>} : vector<8x108xbf16>, vector<108x512xbf16>, vector<8x512xf32> -> vector<8x512xf32>
    %c0_4 = arith.constant 0 : index
    %c0_5 = arith.constant 0 : index
    %4 = vector.load %arg3[%c0_4, %c0_5] : memref<8x1xf32, #tpu.memory_space<vmem>>, vector<8x1xf32>
    %5 = vector.broadcast %4 : vector<8x1xf32> to vector<8x512xf32>
    %6 = arith.addf %3, %5 : vector<8x512xf32>
    %cst_6 = arith.constant dense<0.000000e+00> : vector<8xf32>
    %7 = vector.multi_reduction <add>, %6, %cst_6 [1] : vector<8x512xf32> to vector<8xf32>
    %8 = vector.shape_cast %7 : vector<8xf32> to vector<8x1xf32>
    %cst_7 = arith.constant 5.120000e+02 : f32
    %9 = vector.broadcast %cst_7 : f32 to vector<8x1xf32>
    %10 = arith.divf %8, %9 : vector<8x1xf32>
    %11 = vector.broadcast %10 : vector<8x1xf32> to vector<8x512xf32>
    %12 = arith.subf %6, %11 : vector<8x512xf32>
    %13 = arith.mulf %12, %12 : vector<8x512xf32>
    %cst_8 = arith.constant dense<0.000000e+00> : vector<8xf32>
    %14 = vector.multi_reduction <add>, %13, %cst_8 [1] : vector<8x512xf32> to vector<8xf32>
    %15 = vector.shape_cast %14 : vector<8xf32> to vector<8x1xf32>
    %cst_9 = arith.constant 5.120000e+02 : f32
    %16 = vector.broadcast %cst_9 : f32 to vector<8x1xf32>
    %17 = arith.divf %15, %16 : vector<8x1xf32>
    %18 = vector.broadcast %10 : vector<8x1xf32> to vector<8x512xf32>
    %19 = arith.subf %6, %18 : vector<8x512xf32>
    %cst_10 = arith.constant 9.99999974E-6 : f32
    %20 = vector.broadcast %cst_10 : f32 to vector<8x1xf32>
    %21 = arith.addf %17, %20 : vector<8x1xf32>
    %22 = math.rsqrt %21 : vector<8x1xf32>
    %23 = vector.broadcast %22 : vector<8x1xf32> to vector<8x512xf32>
    %24 = arith.mulf %19, %23 : vector<8x512xf32>
    %cst_11 = arith.constant 5.000000e-01 : f32
    %25 = vector.broadcast %cst_11 : f32 to vector<8x512xf32>
    %26 = arith.mulf %25, %24 : vector<8x512xf32>
    %cst_12 = arith.constant 0.707106769 : f32
    %27 = vector.broadcast %cst_12 : f32 to vector<8x512xf32>
    %28 = arith.mulf %24, %27 : vector<8x512xf32>
    %29 = math.erf %28 : vector<8x512xf32>
    %cst_13 = arith.constant 1.000000e+00 : f32
    %30 = vector.broadcast %cst_13 : f32 to vector<8x512xf32>
    %31 = arith.addf %30, %29 : vector<8x512xf32>
    %32 = arith.mulf %26, %31 : vector<8x512xf32>
    %33 = arith.truncf %32 : vector<8x512xf32> to vector<8x512xbf16>
    %c0_14 = arith.constant 0 : index
    %c0_15 = arith.constant 0 : index
    %c0_16 = arith.constant 0 : index
    %34 = vector.load %arg4[%c0_14, %c0_15, %c0_16] : memref<1x8x512xbf16, #tpu.memory_space<vmem>>, vector<1x8x512xbf16>
    %35 = vector.shape_cast %34 : vector<1x8x512xbf16> to vector<8x512xbf16>
    %36 = vector.shape_cast %33 : vector<8x512xbf16> to vector<1x8x512xbf16>
    tpu.vector_store %arg4[%c0_14, %c0_15, %c0_16], %36 {strides = array<i32>} : memref<1x8x512xbf16, #tpu.memory_space<vmem>>, vector<1x8x512xbf16>,
    return
  }
  func.func @transform_0(%arg0: i32) -> (i32, i32, i32) {
    %c0_i32 = arith.constant 0 : i32
    %c0_i32_0 = arith.constant 0 : i32
    %c0_i32_1 = arith.constant 0 : i32
    return %arg0, %c0_i32, %c0_i32_0 : i32, i32, i32
  }
  func.func @transform_1(%arg0: i32) -> (i32, i32) {
    %c0_i32 = arith.constant 0 : i32
    %c0_i32_0 = arith.constant 0 : i32
    %c0_i32_1 = arith.constant 0 : i32
    return %c0_i32, %c0_i32_0 : i32, i32
  }
  func.func @transform_2(%arg0: i32) -> (i32, i32) {
    %c0_i32 = arith.constant 0 : i32
    %c0_i32_0 = arith.constant 0 : i32
    %c0_i32_1 = arith.constant 0 : i32
    return %c0_i32, %c0_i32_0 : i32, i32
  }
  func.func @transform_3(%arg0: i32) -> (i32, i32, i32) {
    %c0_i32 = arith.constant 0 : i32
    %c0_i32_0 = arith.constant 0 : i32
    %c0_i32_1 = arith.constant 0 : i32
    return %arg0, %c0_i32, %c0_i32_0 : i32, i32, i32
  }
}

module attributes {stable_mosaic.version = 11 : i64} {
  func.func @conv_res_pool_kernel(%arg0: i32, %arg1: memref<1x216x512xbf16, #tpu.memory_space<vmem>>, %arg2: memref<8x216xbf16, #tpu.memory_space<vmem>>, %arg3: memref<8x1xf32, #tpu.memory_space<vmem>>, %arg4: memref<1x8x512xbf16, #tpu.memory_space<vmem>>, %arg5: memref<1x8x64xf32, #tpu.memory_space<vmem>>) attributes {dimension_semantics = [#tpu.dimension_semantics<parallel>], iteration_bounds = array<i64: 2>, scalar_prefetch = 0 : i64, scratch_operands = 0 : i64, tpu.core_type = #tpu.core_type<tc>, window_params = [{transform_indices = @transform_0, window_bounds = array<i64: 1, 216, 512>}, {pipeline_mode = #tpu.pipeline_mode<synchronous>, transform_indices = @transform_1, window_bounds = array<i64: 8, 216>}, {pipeline_mode = #tpu.pipeline_mode<synchronous>, transform_indices = @transform_2, window_bounds = array<i64: 8, 1>}, {transform_indices = @transform_3, window_bounds = array<i64: 1, 8, 512>}, {transform_indices = @transform_4, window_bounds = array<i64: 1, 8, 64>}]} {
    %c0 = arith.constant 0 : index
    %c0_0 = arith.constant 0 : index
    %0 = vector.load %arg2[%c0, %c0_0] : memref<8x216xbf16, #tpu.memory_space<vmem>>, vector<8x216xbf16>
    %c0_1 = arith.constant 0 : index
    %c0_2 = arith.constant 0 : index
    %c0_3 = arith.constant 0 : index
    %1 = vector.load %arg1[%c0_1, %c0_2, %c0_3] : memref<1x216x512xbf16, #tpu.memory_space<vmem>>, vector<1x216x512xbf16>
    %2 = vector.shape_cast %1 : vector<1x216x512xbf16> to vector<216x512xbf16>
    %cst = arith.constant dense<0.000000e+00> : vector<8x512xf32>
    %3 = tpu.matmul %0, %2, %cst {dimension_numbers = #tpu.dot_dimension_numbers<[1], [0], [0], [1], [0, 0, 1, 1], [], []>} : vector<8x216xbf16>, vector<216x512xbf16>, vector<8x512xf32> -> vector<8x512xf32>
    %c0_4 = arith.constant 0 : index
    %c0_5 = arith.constant 0 : index
    %4 = vector.load %arg3[%c0_4, %c0_5] : memref<8x1xf32, #tpu.memory_space<vmem>>, vector<8x1xf32>
    %5 = vector.broadcast %4 : vector<8x1xf32> to vector<8x512xf32>
    %6 = arith.addf %3, %5 : vector<8x512xf32>
    %cst_6 = arith.constant dense<0.000000e+00> : vector<8xf32>
    %7 = vector.multi_reduction <add>, %6, %cst_6 [1] : vector<8x512xf32> to vector<8xf32>
    %8 = vector.shape_cast %7 : vector<8xf32> to vector<8x1xf32>
    %cst_7 = arith.constant 5.120000e+02 : f32
    %9 = vector.broadcast %cst_7 : f32 to vector<8x1xf32>
    %10 = arith.divf %8, %9 : vector<8x1xf32>
    %11 = vector.broadcast %10 : vector<8x1xf32> to vector<8x512xf32>
    %12 = arith.subf %6, %11 : vector<8x512xf32>
    %13 = arith.mulf %12, %12 : vector<8x512xf32>
    %cst_8 = arith.constant dense<0.000000e+00> : vector<8xf32>
    %14 = vector.multi_reduction <add>, %13, %cst_8 [1] : vector<8x512xf32> to vector<8xf32>
    %15 = vector.shape_cast %14 : vector<8xf32> to vector<8x1xf32>
    %cst_9 = arith.constant 5.120000e+02 : f32
    %16 = vector.broadcast %cst_9 : f32 to vector<8x1xf32>
    %17 = arith.divf %15, %16 : vector<8x1xf32>
    %18 = vector.broadcast %10 : vector<8x1xf32> to vector<8x512xf32>
    %19 = arith.subf %6, %18 : vector<8x512xf32>
    %cst_10 = arith.constant 9.99999974E-6 : f32
    %20 = vector.broadcast %cst_10 : f32 to vector<8x1xf32>
    %21 = arith.addf %17, %20 : vector<8x1xf32>
    %22 = math.rsqrt %21 : vector<8x1xf32>
    %23 = vector.broadcast %22 : vector<8x1xf32> to vector<8x512xf32>
    %24 = arith.mulf %19, %23 : vector<8x512xf32>
    %cst_11 = arith.constant 5.000000e-01 : f32
    %25 = vector.broadcast %cst_11 : f32 to vector<8x512xf32>
    %26 = arith.mulf %25, %24 : vector<8x512xf32>
    %cst_12 = arith.constant 0.707106769 : f32
    %27 = vector.broadcast %cst_12 : f32 to vector<8x512xf32>
    %28 = arith.mulf %24, %27 : vector<8x512xf32>
    %29 = math.erf %28 : vector<8x512xf32>
    %cst_13 = arith.constant 1.000000e+00 : f32
    %30 = vector.broadcast %cst_13 : f32 to vector<8x512xf32>
    %31 = arith.addf %30, %29 : vector<8x512xf32>
    %32 = arith.mulf %26, %31 : vector<8x512xf32>
    %c0_14 = arith.constant 0 : index
    %c0_15 = arith.constant 0 : index
    %c0_16 = arith.constant 0 : index
    %33 = vector.load %arg4[%c0_14, %c0_15, %c0_16] : memref<1x8x512xbf16, #tpu.memory_space<vmem>>, vector<1x8x512xbf16>
    %34 = vector.shape_cast %33 : vector<1x8x512xbf16> to vector<8x512xbf16>
    %35 = arith.extf %34 : vector<8x512xbf16> to vector<8x512xf32>
    %36 = arith.addf %35, %32 : vector<8x512xf32>
    %cst_17 = arith.constant 0.70721358 : f32
    %37 = vector.broadcast %cst_17 : f32 to vector<8x512xf32>
    %38 = arith.mulf %36, %37 : vector<8x512xf32>
    %39 = vector.extract_strided_slice %38 {offsets = [0, 0], sizes = [8, 64], strides = [1, 1]} : vector<8x512xf32> to vector<8x64xf32>
    %40 = vector.extract_strided_slice %38 {offsets = [0, 64], sizes = [8, 64], strides = [1, 1]} : vector<8x512xf32> to vector<8x64xf32>
    %41 = arith.maximumf %39, %40 : vector<8x64xf32>
    %42 = vector.extract_strided_slice %38 {offsets = [0, 128], sizes = [8, 64], strides = [1, 1]} : vector<8x512xf32> to vector<8x64xf32>
    %43 = arith.maximumf %41, %42 : vector<8x64xf32>
    %44 = vector.extract_strided_slice %38 {offsets = [0, 192], sizes = [8, 64], strides = [1, 1]} : vector<8x512xf32> to vector<8x64xf32>
    %45 = arith.maximumf %43, %44 : vector<8x64xf32>
    %46 = vector.extract_strided_slice %38 {offsets = [0, 256], sizes = [8, 64], strides = [1, 1]} : vector<8x512xf32> to vector<8x64xf32>
    %47 = arith.maximumf %45, %46 : vector<8x64xf32>
    %48 = vector.extract_strided_slice %38 {offsets = [0, 320], sizes = [8, 64], strides = [1, 1]} : vector<8x512xf32> to vector<8x64xf32>
    %49 = arith.maximumf %47, %48 : vector<8x64xf32>
    %50 = vector.extract_strided_slice %38 {offsets = [0, 384], sizes = [8, 64], strides = [1, 1]} : vector<8x512xf32> to vector<8x64xf32>
    %51 = arith.maximumf %49, %50 : vector<8x64xf32>
    %52 = vector.extract_strided_slice %38 {offsets = [0, 448], sizes = [8, 64], strides = [1, 1]} : vector<8x512xf32> to vector<8x64xf32>
    %53 = arith.maximumf %51, %52 : vector<8x64xf32>
    %c0_18 = arith.constant 0 : index
    %c0_19 = arith.constant 0 : index
    %c0_20 = arith.constant 0 : index
    %54 = vector.load %arg5[%c0_18, %c0_19, %c0_20] : memref<1x8x64xf32, #tpu.memory_space<vmem>>, vector<1x8x64xf32>
    %55 = vector.shape_cast %54 : vector<1x8x64xf32> to vector<8x64xf32>
    %56 = vector.shape_cast %53 : vector<8x64xf32> to vector<1x8x64xf32>
    tpu.vector_store %arg5[%c0_18, %c0_19, %c0_20], %56 {strides = array<i32>} : memref<1x8x64xf32, #tpu.memory_space<vmem>>, vector<1x8x64xf32>,
    return
  }
  func.func @transform_0(%arg0: i32) -> (i32, i32, i32) {
    %c0_i32 = arith.constant 0 : i32
    %c0_i32_0 = arith.constant 0 : i32
    %c0_i32_1 = arith.constant 0 : i32
    return %arg0, %c0_i32, %c0_i32_0 : i32, i32, i32
  }
  func.func @transform_1(%arg0: i32) -> (i32, i32) {
    %c0_i32 = arith.constant 0 : i32
    %c0_i32_0 = arith.constant 0 : i32
    %c0_i32_1 = arith.constant 0 : i32
    return %c0_i32, %c0_i32_0 : i32, i32
  }
  func.func @transform_2(%arg0: i32) -> (i32, i32) {
    %c0_i32 = arith.constant 0 : i32
    %c0_i32_0 = arith.constant 0 : i32
    %c0_i32_1 = arith.constant 0 : i32
    return %c0_i32, %c0_i32_0 : i32, i32
  }
  func.func @transform_3(%arg0: i32) -> (i32, i32, i32) {
    %c0_i32 = arith.constant 0 : i32
    %c0_i32_0 = arith.constant 0 : i32
    %c0_i32_1 = arith.constant 0 : i32
    return %arg0, %c0_i32, %c0_i32_0 : i32, i32, i32
  }
  func.func @transform_4(%arg0: i32) -> (i32, i32, i32) {
    %c0_i32 = arith.constant 0 : i32
    %c0_i32_0 = arith.constant 0 : i32
    %c0_i32_1 = arith.constant 0 : i32
    return %arg0, %c0_i32, %c0_i32_0 : i32, i32, i32
  }
}

</mosaic_0001>

<bundles_post_ra>
// kernel: unet_down.2
= control target key start
LH: loop header
LB: loop body
LE: loop exit
PB: predicated region body
PF: predicated region fallthrough
CT: control target
= control target key end

     0   :  { %s701_s12 = smov 0   ;;  %s758_s0 = inlined_call_operand.vmem [shape: bf16[2,108,512], index: 0, kind: input, shape index: {}]   ;;  %s759_s1 = inlined_call_operand.vmem [shape: bf16[8,108], index: 1, kind: input, shape index: {}]   ;;  %s760_s2 = inlined_call_operand.vmem [shape: f32[8,1], index: 2, kind: input, shape index: {}]   ;;  %s761_s3 = inlined_call_operand.vmem [shape: bf16[2,8,512], index: 3, kind: output, shape index: {}]  }
   0x1 LB: > { %s562_s13 = sadd.s32 4294967295, %s678_s12   ;;  %p566_p0 = scmp.ge.s32.totalorder %s678_s12, 1  ;;  %s678_s12 = sphi %s701_s12, %s13_s12  }
   0x2   : > { %p137_p1 = scmp.lt.s32.totalorder %s678_s12, 3 }
   0x4   : > { %p138_p2 = pnand %p566_p0, %p137_p1 }
   0x5   : > { %p161_p3 = scmp.lt.s32.totalorder (!%p138_p2), %s562_s13, 1  ;;  %v680_v0 = vmov (!%p138_p2), 0   ;;  %v201_v1 = vld [vmem:[%s760_s2] sm:$0xff] (!%p138_p2)  ;;  %vm347_vm0 = vcmask (!%p138_p2), 1045504   ;;  %vm343_vm1 = vcmask (!%p138_p2), 883712  }
   0x6   : > { %141 = sbr.rel (%p138_p2) target bundleno = 603 (0x25b), region = 32  ;;  %392 = vmatprep.mubr.bf16.mxu0 (!%p138_p2), %v680_v0  ;;  %433 = vmatprep.mubr.bf16.mxu1 (!%p138_p2), %v680_v0  ;;  %v172_v32 = vld [vmem:[%s759_s1] sm:$0xf] (!%p138_p2) }
   0x7   : > { %619 = vset.pattern.permute.xlu0 (!%p138_p2), %v680_v0 }
   0x8   : > { %204 = vperm.xlu0 (!%p138_p2), %619, %v201_v1  }
   0xd   : > { %s763_s13 = smov (!%p161_p3, %s562_s13), 1 }
   0xe   : > { %s609_s16 = smul.u32 224, %s763_s13  ;;  %s606_s22 = sshll.u32 %s763_s13, 4 }
   0xf   : > { %s170_s25 = scalar_lea.vmem %s761_s3, %s606_s22 }
  0x10   : > { %s718_s19 = scalar_lea.vmem %s758_s0, %s609_s16 }
  0x11   : > { %v620_v2 = vld [vmem:[%s718_s19 + $0x4] ss:$16 sps:$4 sm:$0xff]   ;;  %v622_v3 = vld [vmem:[%s718_s19 + $0xc] ss:$16 sps:$4 sm:$0xff]   ;;  %v624_v4 = vld [vmem:[%s718_s19] ss:$16 sps:$4 sm:$0xff]  }
  0x12   : > { %360 = vmatprep.subr.bf16.mxu0 %v620_v2  ;;  %v625_v5 = vld [vmem:[%s718_s19 + $0x8] ss:$16 sps:$4 sm:$0xff]   ;;  %401 = vmatprep.subr.bf16.mxu1 %v622_v3  ;;  %v626_v6 = vld [vmem:[%s718_s19 + $0x24] ss:$16 sps:$4 sm:$0xff]   ;;  %v628_v7 = vld [vmem:[%s718_s19 + $0x2c] ss:$16 sps:$4 sm:$0xff]  }
  0x13   : > { %361 = vmatpush1.bf16.msra.mxu0 %v624_v4  ;;  %402 = vmatpush1.bf16.msra.mxu1 %v625_v5  ;;  %v630_v8 = vld [vmem:[%s718_s19 + $0x20] ss:$16 sps:$4 sm:$0xff]   ;;  %v631_v9 = vld [vmem:[%s718_s19 + $0x28] ss:$16 sps:$4 sm:$0xff]   ;;  %v632_v10 = vld [vmem:[%s718_s19 + $0x44] ss:$16 sps:$4 sm:$0xff]  }
  0x14   : > { %362 = vmatprep.subr.bf16.mxu0 %v626_v6  ;;  %403 = vmatprep.subr.bf16.mxu1 %v628_v7  ;;  %v634_v11 = vld [vmem:[%s718_s19 + $0x4c] ss:$16 sps:$4 sm:$0xff]   ;;  %v636_v12 = vld [vmem:[%s718_s19 + $0x40] ss:$16 sps:$4 sm:$0xff]   ;;  %v637_v13 = vld [vmem:[%s718_s19 + $0x48] ss:$16 sps:$4 sm:$0xff]  }
  0x15   : > { %v638_v14 = vld [vmem:[%s718_s19 + $0x64] ss:$16 sps:$4 sm:$0xff]   ;;  %v640_v15 = vld [vmem:[%s718_s19 + $0x6c] ss:$16 sps:$4 sm:$0xff]   ;;  %v642_v16 = vld [vmem:[%s718_s19 + $0x60] ss:$16 sps:$4 sm:$0xff]  }
  0x16   : > { %v643_v17 = vld [vmem:[%s718_s19 + $0x68] ss:$16 sps:$4 sm:$0xff]   ;;  %v644_v18 = vld [vmem:[%s718_s19 + $0x84] ss:$16 sps:$4 sm:$0xff]   ;;  %v646_v19 = vld [vmem:[%s718_s19 + $0x8c] ss:$16 sps:$4 sm:$0xff]  }
  0x17   : > { %363 = vmatpush1.bf16.msra.mxu0 %v630_v8  ;;  %404 = vmatpush1.bf16.msra.mxu1 %v631_v9  ;;  %v648_v20 = vld [vmem:[%s718_s19 + $0x80] ss:$16 sps:$4 sm:$0xff]   ;;  %v649_v21 = vld [vmem:[%s718_s19 + $0x88] ss:$16 sps:$4 sm:$0xff]   ;;  %v650_v22 = vld [vmem:[%s718_s19 + $0xa4] ss:$16 sps:$4 sm:$0xff]  }
  0x18   : > { %364 = vmatprep.subr.bf16.mxu0 %v632_v10  ;;  %405 = vmatprep.subr.bf16.mxu1 %v634_v11  ;;  %v652_v23 = vld [vmem:[%s718_s19 + $0xac] ss:$16 sps:$4 sm:$0xff]   ;;  %v654_v24 = vld [vmem:[%s718_s19 + $0xa0] ss:$16 sps:$4 sm:$0xff]   ;;  %v655_v25 = vld [vmem:[%s718_s19 + $0xa8] ss:$16 sps:$4 sm:$0xff]  }
  0x19   : > { %v656_v26 = vld [vmem:[%s718_s19 + $0xc4] ss:$16 sps:$4 sm:$0x3f]   ;;  %v658_v27 = vld [vmem:[%s718_s19 + $0xcc] ss:$16 sps:$4 sm:$0x3f]  }
  0x1a   : > { %v660_v28 = vld [vmem:[%s718_s19 + $0xc0] ss:$16 sps:$4 sm:$0x3f]   ;;  %v661_v29 = vld [vmem:[%s718_s19 + $0xc8] ss:$16 sps:$4 sm:$0x3f]  }
  0x1b   : > { %365 = vmatpush1.bf16.msra.mxu0 %v636_v12  ;;  %406 = vmatpush1.bf16.msra.mxu1 %v637_v13  ;;  %v349_v30 = vsel %vm347_vm0, %v660_v28, 0  ;;  %v355_v31 = vsel %vm347_vm0, %v661_v29, 0 }
  0x1c   : > { %366 = vmatprep.subr.bf16.mxu0 %v638_v14  ;;  %407 = vmatprep.subr.bf16.mxu1 %v640_v15 }
  0x1f   : > { %367 = vmatpush1.bf16.msra.mxu0 %v642_v16  ;;  %408 = vmatpush1.bf16.msra.mxu1 %v643_v17 }
  0x20   : > { %368 = vmatprep.subr.bf16.mxu0 %v644_v18  ;;  %409 = vmatprep.subr.bf16.mxu1 %v646_v19 }
  0x23   : > { %369 = vmatpush1.bf16.msra.mxu0 %v648_v20  ;;  %410 = vmatpush1.bf16.msra.mxu1 %v649_v21 }
  0x24   : > { %370 = vmatprep.subr.bf16.mxu0 %v650_v22  ;;  %411 = vmatprep.subr.bf16.mxu1 %v652_v23 }
  0x27   : > { %371 = vmatpush1.bf16.msra.mxu0 %v654_v24  ;;  %412 = vmatpush1.bf16.msra.mxu1 %v655_v25 }
  0x28   : > { %598 = vmatprep.subr.msk.bf16.mxu0 %vm347_vm0, %v656_v26  ;;  %600 = vmatprep.subr.msk.bf16.mxu1 %vm347_vm0, %v658_v27 }
  0x2b   : > { %373 = vmatpush1.bf16.msra.mxu0 %v349_v30  ;;  %414 = vmatpush1.bf16.msra.mxu1 %v355_v31 }
  0x2e   : > { %599 = vmatmul.mubr.msk.bf16.vlgmr.msra.gmra.mrb[0].mxu0 %vm343_vm1, %v172_v32  ;;  %601 = vmatmul.mubr.msk.bf16.vlgmr.msra.gmra.mrb[0].mxu1 %vm343_vm1, %v172_v32 }
  0x87   : > { %v205_v33 = vpop.permute.xlu0 %204 }
 0x101   : > { %v394_v34 = vpop.f32.mrb[0].mxu0  ;;  %v435_v35 = vpop.f32.mrb[0].mxu1 }
 0x102   : > { %v395_v36 = vadd.f32 %v394_v34, %v205_v33  ;;  %v396_v37 = vpop.f32.mrb[1].mxu0  ;;  %v437_v38 = vpop.f32.mrb[1].mxu1  ;;  %v436_v44 = vadd.f32 %v435_v35, %v205_v33 }
 0x103   : > { %v397_v39 = vadd.f32 %v396_v37, %v205_v33  ;;  %v398_v40 = vpop.f32.mrb[2].mxu0  ;;  %v439_v41 = vpop.f32.mrb[2].mxu1  ;;  %v438_v46 = vadd.f32 %v437_v38, %v205_v33 }
 0x104   : > { %v399_v42 = vpop.f32.mrb[3].mxu0  ;;  %v440_v43 = vpop.f32.mrb[3].mxu1 }
 0x105   : > { %v442_v45 = vadd.f32 %v397_v39, %v395_v36 }
 0x107   : > { %v443_v47 = vadd.f32 %v442_v45, %v436_v44 }
 0x109   : > { %v444_v48 = vadd.f32 %v443_v47, %v438_v46 }
 0x10b   : > { %445 = vadd.xlane.f32.xlu0 %v444_v48 }
 0x198   : > { %v446_v49 = vpop.xlane.xlu0 %445 }
 0x199   : > { %v448_v50 = vmul.f32 0.001953125, %v446_v49 }
 0x19b   : > { %v449_v51 = vsub.f32 %v395_v36, %v448_v50  ;;  %v450_v52 = vsub.f32 %v397_v39, %v448_v50  ;;  %v451_v53 = vsub.f32 %v436_v44, %v448_v50  ;;  %v452_v54 = vsub.f32 %v438_v46, %v448_v50 }
 0x19d   : > { %v453_v55 = vmul.f32 %v449_v51, %v449_v51  ;;  %v454_v56 = vmul.f32 %v450_v52, %v450_v52  ;;  %v455_v57 = vmul.f32 %v451_v53, %v451_v53  ;;  %v456_v59 = vmul.f32 %v452_v54, %v452_v54 }
 0x19f   : > { %v457_v58 = vadd.f32 %v454_v56, %v453_v55 }
 0x1a1   : > { %v458_v60 = vadd.f32 %v457_v58, %v455_v57 }
 0x1a3   : > { %v459_v61 = vadd.f32 %v458_v60, %v456_v59 }
 0x1a5   : > { %460 = vadd.xlane.f32.xlu1 %v459_v61 }
 0x232   : > { %v461_v62 = vpop.xlane.xlu1 %460 }
 0x233   : > { %v462_v63 = vmul.f32 0.001953125, %v461_v62 }
 0x235   : > { %v463_v0 = vadd.f32 1e-05, %v462_v63 }
 0x237   : > { %662 = vrsqrt.f32 %v463_v0 }
 0x241   : > { %v663_v1 = vpop.eup %662 }
 0x242   : > { %v465_v2 = vmul.f32 %v663_v1, %v449_v51  ;;  %v466_v3 = vmul.f32 %v663_v1, %v450_v52  ;;  %v467_v4 = vmul.f32 %v663_v1, %v451_v53  ;;  %v468_v5 = vmul.f32 %v663_v1, %v452_v54 }
 0x244   : > { %v473_v6 = vmul.f32 0.70710677, %v465_v2  ;;  %v474_v7 = vmul.f32 0.70710677, %v466_v3  ;;  %v475_v8 = vmul.f32 0.70710677, %v467_v4 }
 0x245   : > { %v476_v9 = vmul.f32 0.70710677, %v468_v5  ;;  %v469_v12 = vmul.f32 0.5, %v465_v2  ;;  %v470_v15 = vmul.f32 0.5, %v466_v3  ;;  %v471_v18 = vmul.f32 0.5, %v467_v4 }
 0x246   : > { %664 = verf.f32 %v473_v6  ;;  %v472_v21 = vmul.f32 0.5, %v468_v5 }
 0x247   : > { %666 = verf.f32 %v474_v7 }
 0x248   : > { %668 = verf.f32 %v475_v8 }
 0x249   : > { %670 = verf.f32 %v476_v9 }
 0x250   : > { %v665_v10 = vpop.eup %664 }
 0x251   : > { %v667_v11 = vpop.eup %666  ;;  %v481_v13 = vadd.f32 1.0, %v665_v10 }
 0x252   : > { %v669_v14 = vpop.eup %668  ;;  %v482_v16 = vadd.f32 1.0, %v667_v11 }
 0x253   : > { %v671_v17 = vpop.eup %670  ;;  %v483_v19 = vadd.f32 1.0, %v669_v14  ;;  %v485_v20 = vmul.f32 %v481_v13, %v469_v12 }
 0x254   : > { %v484_v22 = vadd.f32 1.0, %v671_v17  ;;  %v486_v23 = vmul.f32 %v482_v16, %v470_v15 }
 0x255   : > { %v487_v24 = vmul.f32 %v483_v19, %v471_v18 }
 0x256   : > { %v488_v25 = vmul.f32 %v484_v22, %v472_v21  ;;  %v607_v26 = vpack.c.bf16 %v486_v23, %v485_v20 }
 0x258   : > { %v608_v27 = vpack.c.bf16 %v488_v25, %v487_v24  ;;  %505 = vst [vmem:[%s170_s25] sm:$0xff] %v607_v26 }
 0x25a   : > { %506 = vst [vmem:[%s170_s25 + $0x8] sm:$0xff] %v608_v27 }
 0x25b PF: > { %s13_s12 = sadd.s32 1, %s678_s12  }
 0x25c   : > { %p10_p4 = scmp.ge.s32.totalorder %s13_s12, 4  }
 0x25e   :  { %12 = sbr.rel (!%p10_p4) target bundleno = 1 (0x1), region = 62 }

// kernel: unet_down.3
= control target key start
LH: loop header
LB: loop body
LE: loop exit
PB: predicated region body
PF: predicated region fallthrough
CT: control target
= control target key end

     0   :  { %s1019_s15 = smov 0   ;;  %s1112_s0 = inlined_call_operand.vmem [shape: bf16[2,216,512], index: 0, kind: input, shape index: {}]   ;;  %s1113_s1 = inlined_call_operand.vmem [shape: bf16[8,216], index: 1, kind: input, shape index: {}]   ;;  %s1114_s2 = inlined_call_operand.vmem [shape: f32[8,1], index: 2, kind: input, shape index: {}]   ;;  %s1115_s3 = inlined_call_operand.vmem [shape: bf16[2,8,512], index: 3, kind: input, shape index: {}]   ;;  %s1116_s4 = inlined_call_operand.vmem [shape: f32[2,8,64], index: 4, kind: output, shape index: {}]  }
   0x1 LB: > { %s804_s16 = sadd.s32 4294967295, %s990_s15   ;;  %p808_p0 = scmp.ge.s32.totalorder %s990_s15, 1  ;;  %s990_s15 = sphi %s1019_s15, %s14_s15  }
   0x2   : > { %p172_p1 = scmp.lt.s32.totalorder %s990_s15, 3 }
   0x4   : > { %p173_p2 = pnand %p808_p0, %p172_p1 }
   0x5   : > { %p202_p3 = scmp.lt.s32.totalorder (!%p173_p2), %s804_s16, 1  ;;  %v1030_v0 = vld [vmem:[%s1113_s1] sm:$0xff] (!%p173_p2)  ;;  %vm554_vm0 = vcmask (!%p173_p2), 719872   ;;  %v992_v3 = vmov (!%p173_p2), 0   ;;  %vm558_vm1 = vcmask (!%p173_p2), 1043456   ;;  %s993_s29 = smov (!%p173_p2), 64  }
   0x6   : > { %176 = sbr.rel (%p173_p2) target bundleno = 759 (0x2f7), region = 36  ;;  %v272_v1 = vld [vmem:[%s1114_s2] sm:$0xff] (!%p173_p2)  ;;  %v814_v2 = vcombine.high (!%p173_p2), %v1030_v0, %v1030_v0  ;;  %889 = vset.pattern.permute.xlu0 (!%p173_p2), %v992_v3  ;;  %vm737_vm2 = vcmask (!%p173_p2), 523264  }
   0x7   : > { %275 = vperm.xlu0 (!%p173_p2), %889, %v272_v1   ;;  %v813_v1 = vcombine.low (!%p173_p2), %v1030_v0, %v1030_v0 }
   0x8   : > { %872 = vmatprep.mubr.msk.bf16.mxu0 (!%p173_p2), %vm554_vm0, %v814_v2  ;;  %874 = vmatprep.mubr.msk.bf16.mxu1 (!%p173_p2), %vm554_vm0, %v814_v2 }
   0xd   : > { %s1118_s16 = smov (!%p202_p3, %s804_s16), 1 }
   0xe   : > { %s878_s21 = smul.u32 432, %s1118_s16  ;;  %s877_s25 = sshll.u32 %s1118_s16, 4 }
   0xf   : > { %s211_s28 = scalar_lea.vmem %s1115_s3, %s877_s25  ;;  %s812_s30 = sshll.u32 %s1118_s16, 3 }
  0x10   : > { %s1043_s24 = scalar_lea.vmem %s1112_s0, %s878_s21  ;;  %s215_s7 = scalar_lea.vmem %s1116_s4, %s812_s30 }
  0x11   : > { %v890_v4 = vld [vmem:[%s1043_s24 + $0x4] ss:$16 sps:$4 sm:$0xff]   ;;  %v892_v5 = vld [vmem:[%s1043_s24 + $0xc] ss:$16 sps:$4 sm:$0xff]   ;;  %v894_v6 = vld [vmem:[%s1043_s24] ss:$16 sps:$4 sm:$0xff]  }
  0x12   : > { %571 = vmatprep.subr.bf16.mxu0 %v890_v4  ;;  %v895_v7 = vld [vmem:[%s1043_s24 + $0x8] ss:$16 sps:$4 sm:$0xff]   ;;  %612 = vmatprep.subr.bf16.mxu1 %v892_v5  ;;  %v896_v8 = vld [vmem:[%s1043_s24 + $0x24] ss:$16 sps:$4 sm:$0xff]   ;;  %v898_v9 = vld [vmem:[%s1043_s24 + $0x2c] ss:$16 sps:$4 sm:$0xff]  }
  0x13   : > { %572 = vmatpush1.bf16.msra.mxu0 %v894_v6  ;;  %613 = vmatpush1.bf16.msra.mxu1 %v895_v7  ;;  %v900_v10 = vld [vmem:[%s1043_s24 + $0x20] ss:$16 sps:$4 sm:$0xff]   ;;  %v901_v11 = vld [vmem:[%s1043_s24 + $0x28] ss:$16 sps:$4 sm:$0xff]   ;;  %v902_v12 = vld [vmem:[%s1043_s24 + $0x44] ss:$16 sps:$4 sm:$0xff]  }
  0x14   : > { %573 = vmatprep.subr.bf16.mxu0 %v896_v8  ;;  %614 = vmatprep.subr.bf16.mxu1 %v898_v9  ;;  %v904_v13 = vld [vmem:[%s1043_s24 + $0x4c] ss:$16 sps:$4 sm:$0xff]   ;;  %v906_v14 = vld [vmem:[%s1043_s24 + $0x40] ss:$16 sps:$4 sm:$0xff]   ;;  %v907_v15 = vld [vmem:[%s1043_s24 + $0x48] ss:$16 sps:$4 sm:$0xff]  }
  0x15   : > { %v908_v16 = vld [vmem:[%s1043_s24 + $0x64] ss:$16 sps:$4 sm:$0xff]   ;;  %v910_v17 = vld [vmem:[%s1043_s24 + $0x6c] ss:$16 sps:$4 sm:$0xff]   ;;  %v912_v18 = vld [vmem:[%s1043_s24 + $0x60] ss:$16 sps:$4 sm:$0xff]  }
  0x16   : > { %v913_v19 = vld [vmem:[%s1043_s24 + $0x68] ss:$16 sps:$4 sm:$0xff]   ;;  %v914_v20 = vld [vmem:[%s1043_s24 + $0x84] ss:$16 sps:$4 sm:$0xff]   ;;  %v916_v21 = vld [vmem:[%s1043_s24 + $0x8c] ss:$16 sps:$4 sm:$0xff]  }
  0x17   : > { %574 = vmatpush1.bf16.msra.mxu0 %v900_v10  ;;  %615 = vmatpush1.bf16.msra.mxu1 %v901_v11  ;;  %v918_v22 = vld [vmem:[%s1043_s24 + $0x80] ss:$16 sps:$4 sm:$0xff]   ;;  %v919_v23 = vld [vmem:[%s1043_s24 + $0x88] ss:$16 sps:$4 sm:$0xff]   ;;  %v920_v24 = vld [vmem:[%s1043_s24 + $0xa4] ss:$16 sps:$4 sm:$0xff]  }
  0x18   : > { %575 = vmatprep.subr.bf16.mxu0 %v902_v12  ;;  %616 = vmatprep.subr.bf16.mxu1 %v904_v13  ;;  %v922_v25 = vld [vmem:[%s1043_s24 + $0xac] ss:$16 sps:$4 sm:$0xff]   ;;  %v924_v26 = vld [vmem:[%s1043_s24 + $0xa0] ss:$16 sps:$4 sm:$0xff]   ;;  %v925_v27 = vld [vmem:[%s1043_s24 + $0xa8] ss:$16 sps:$4 sm:$0xff]  }
  0x19   : > { %v926_v28 = vld [vmem:[%s1043_s24 + $0xc4] ss:$16 sps:$4 sm:$0xff]   ;;  %v928_v29 = vld [vmem:[%s1043_s24 + $0xcc] ss:$16 sps:$4 sm:$0xff]   ;;  %v930_v30 = vld [vmem:[%s1043_s24 + $0xc0] ss:$16 sps:$4 sm:$0xff]  }
  0x1a   : > { %v931_v31 = vld [vmem:[%s1043_s24 + $0xc8] ss:$16 sps:$4 sm:$0xff]   ;;  %v932_v32 = vld [vmem:[%s1043_s24 + $0xe4] ss:$16 sps:$4 sm:$0xff]   ;;  %v934_v33 = vld [vmem:[%s1043_s24 + $0xec] ss:$16 sps:$4 sm:$0xff]  }
  0x1b   : > { %576 = vmatpush1.bf16.msra.mxu0 %v906_v14  ;;  %617 = vmatpush1.bf16.msra.mxu1 %v907_v15  ;;  %v936_v34 = vld [vmem:[%s1043_s24 + $0xe0] ss:$16 sps:$4 sm:$0xff]   ;;  %v937_v35 = vld [vmem:[%s1043_s24 + $0xe8] ss:$16 sps:$4 sm:$0xff]   ;;  %v938_v36 = vld [vmem:[%s1043_s24 + $0x104] ss:$16 sps:$4 sm:$0xff]  }
  0x1c   : > { %577 = vmatprep.subr.bf16.mxu0 %v908_v16  ;;  %618 = vmatprep.subr.bf16.mxu1 %v910_v17  ;;  %v940_v37 = vld [vmem:[%s1043_s24 + $0x10c] ss:$16 sps:$4 sm:$0xff]   ;;  %v942_v38 = vld [vmem:[%s1043_s24 + $0x100] ss:$16 sps:$4 sm:$0xff]   ;;  %v943_v39 = vld [vmem:[%s1043_s24 + $0x108] ss:$16 sps:$4 sm:$0xff]  }
  0x1d   : > { %v944_v40 = vld [vmem:[%s1043_s24 + $0x124] ss:$16 sps:$4 sm:$0xff]   ;;  %v946_v41 = vld [vmem:[%s1043_s24 + $0x12c] ss:$16 sps:$4 sm:$0xff]   ;;  %v948_v42 = vld [vmem:[%s1043_s24 + $0x120] ss:$16 sps:$4 sm:$0xff]  }
  0x1e   : > { %v949_v43 = vld [vmem:[%s1043_s24 + $0x128] ss:$16 sps:$4 sm:$0xff]   ;;  %v950_v44 = vld [vmem:[%s1043_s24 + $0x144] ss:$16 sps:$4 sm:$0xff]   ;;  %v952_v45 = vld [vmem:[%s1043_s24 + $0x14c] ss:$16 sps:$4 sm:$0xff]  }
  0x1f   : > { %578 = vmatpush1.bf16.msra.mxu0 %v912_v18  ;;  %619 = vmatpush1.bf16.msra.mxu1 %v913_v19  ;;  %v954_v46 = vld [vmem:[%s1043_s24 + $0x140] ss:$16 sps:$4 sm:$0xff]   ;;  %v955_v47 = vld [vmem:[%s1043_s24 + $0x148] ss:$16 sps:$4 sm:$0xff]   ;;  %v956_v48 = vld [vmem:[%s1043_s24 + $0x164] ss:$16 sps:$4 sm:$0xff]  }
  0x20   : > { %579 = vmatprep.subr.bf16.mxu0 %v914_v20  ;;  %620 = vmatprep.subr.bf16.mxu1 %v916_v21  ;;  %v958_v49 = vld [vmem:[%s1043_s24 + $0x16c] ss:$16 sps:$4 sm:$0xff]   ;;  %v960_v50 = vld [vmem:[%s1043_s24 + $0x160] ss:$16 sps:$4 sm:$0xff]   ;;  %v961_v51 = vld [vmem:[%s1043_s24 + $0x168] ss:$16 sps:$4 sm:$0xff]  }
  0x21   : > { %v962_v52 = vld [vmem:[%s1043_s24 + $0x184] ss:$16 sps:$4 sm:$0xff]   ;;  %v964_v53 = vld [vmem:[%s1043_s24 + $0x18c] ss:$16 sps:$4 sm:$0xff]   ;;  %v966_v56 = vld [vmem:[%s1043_s24 + $0x180] ss:$16 sps:$4 sm:$0xff]  }
  0x22   : > { %v270_v54 = vld [vmem:[%s1043_s24 + $0x1a0] sm:$0xff]  ;;  %v271_v55 = vld [vmem:[%s1043_s24 + $0x1a8] sm:$0xff] }
  0x23   : > { %580 = vmatpush1.bf16.msra.mxu0 %v918_v22  ;;  %621 = vmatpush1.bf16.msra.mxu1 %v919_v23  ;;  %v967_v57 = vld [vmem:[%s1043_s24 + $0x188] ss:$16 sps:$4 sm:$0xff]   ;;  %v868_v58 = vcombine.high %v270_v54, %v270_v54  ;;  %v870_v59 = vcombine.high %v271_v55, %v271_v55  ;;  %v867_v60 = vcombine.low %v270_v54, %v270_v54 }
  0x24   : > { %581 = vmatprep.subr.bf16.mxu0 %v920_v24  ;;  %622 = vmatprep.subr.bf16.mxu1 %v922_v25  ;;  %v869_v61 = vcombine.low %v271_v55, %v271_v55  ;;  %v701_v54 = vld [vmem:[%s211_s28 + $0x8] sm:$0xff] }
  0x25   : > { %v560_v62 = vsel %vm558_vm1, %v867_v60, 0 }
  0x26   : > { %v566_v63 = vsel %vm558_vm1, %v869_v61, 0 }
  0x27   : > { %582 = vmatpush1.bf16.msra.mxu0 %v924_v26  ;;  %623 = vmatpush1.bf16.msra.mxu1 %v925_v27 }
  0x28   : > { %583 = vmatprep.subr.bf16.mxu0 %v926_v28  ;;  %624 = vmatprep.subr.bf16.mxu1 %v928_v29 }
  0x2b   : > { %584 = vmatpush1.bf16.msra.mxu0 %v930_v30  ;;  %625 = vmatpush1.bf16.msra.mxu1 %v931_v31 }
  0x2c   : > { %585 = vmatprep.subr.bf16.mxu0 %v932_v32  ;;  %626 = vmatprep.subr.bf16.mxu1 %v934_v33 }
  0x2f   : > { %586 = vmatpush1.bf16.msra.mxu0 %v936_v34  ;;  %627 = vmatpush1.bf16.msra.mxu1 %v937_v35 }
  0x30   : > { %587 = vmatprep.subr.bf16.mxu0 %v938_v36  ;;  %628 = vmatprep.subr.bf16.mxu1 %v940_v37 }
  0x33   : > { %588 = vmatpush1.bf16.msra.mxu0 %v942_v38  ;;  %629 = vmatpush1.bf16.msra.mxu1 %v943_v39 }
  0x34   : > { %589 = vmatprep.subr.bf16.mxu0 %v944_v40  ;;  %630 = vmatprep.subr.bf16.mxu1 %v946_v41 }
  0x37   : > { %590 = vmatpush1.bf16.msra.mxu0 %v948_v42  ;;  %631 = vmatpush1.bf16.msra.mxu1 %v949_v43  ;;  %v700_v42 = vld [vmem:[%s211_s28] sm:$0xff] }
  0x38   : > { %591 = vmatprep.subr.bf16.mxu0 %v950_v44  ;;  %632 = vmatprep.subr.bf16.mxu1 %v952_v45 }
  0x3b   : > { %592 = vmatpush1.bf16.msra.mxu0 %v954_v46  ;;  %633 = vmatpush1.bf16.msra.mxu1 %v955_v47  ;;  %v702_v47 = vunpack.c.l.bf16 %v700_v42 }
  0x3c   : > { %593 = vmatprep.subr.bf16.mxu0 %v956_v48  ;;  %634 = vmatprep.subr.bf16.mxu1 %v958_v49 }
  0x3f   : > { %594 = vmatpush1.bf16.msra.mxu0 %v960_v50  ;;  %635 = vmatpush1.bf16.msra.mxu1 %v961_v51 }
  0x40   : > { %595 = vmatprep.subr.bf16.mxu0 %v962_v52  ;;  %636 = vmatprep.subr.bf16.mxu1 %v964_v53  ;;  %v703_v52 = vunpack.c.h.bf16 %v700_v42 }
  0x43   : > { %596 = vmatpush1.bf16.msra.mxu0 %v966_v56  ;;  %637 = vmatpush1.bf16.msra.mxu1 %v967_v57 }
  0x44   : > { %871 = vmatprep.subr.msk.bf16.mxu0 %vm558_vm1, %v868_v58  ;;  %873 = vmatprep.subr.msk.bf16.mxu1 %vm558_vm1, %v870_v59  ;;  %v704_v59 = vunpack.c.l.bf16 %v701_v54 }
  0x47   : > { %598 = vmatpush1.bf16.msra.mxu0 %v560_v62  ;;  %639 = vmatpush1.bf16.msra.mxu1 %v566_v63 }
  0x4a   : > { %604 = vmatmul.mubr.bf16.vlgmr.msra.gmra.mrb[0].mxu0 %v813_v1  ;;  %645 = vmatmul.mubr.bf16.vlgmr.msra.gmra.mrb[0].mxu1 %v813_v1 }
  0x86   : > { %v276_v2 = vpop.permute.xlu0 %275 }
 0x11d   : > { %v605_v3 = vpop.f32.mrb[0].mxu0  ;;  %v646_v4 = vpop.f32.mrb[0].mxu1 }
 0x11e   : > { %v606_v5 = vadd.f32 %v605_v3, %v276_v2  ;;  %v607_v6 = vpop.f32.mrb[1].mxu0  ;;  %v648_v7 = vpop.f32.mrb[1].mxu1  ;;  %v647_v13 = vadd.f32 %v646_v4, %v276_v2 }
 0x11f   : > { %v608_v8 = vadd.f32 %v607_v6, %v276_v2  ;;  %v609_v9 = vpop.f32.mrb[2].mxu0  ;;  %v650_v10 = vpop.f32.mrb[2].mxu1  ;;  %v649_v15 = vadd.f32 %v648_v7, %v276_v2 }
 0x120   : > { %v610_v11 = vpop.f32.mrb[3].mxu0  ;;  %v651_v12 = vpop.f32.mrb[3].mxu1 }
 0x121   : > { %v653_v14 = vadd.f32 %v608_v8, %v606_v5 }
 0x123   : > { %v654_v16 = vadd.f32 %v653_v14, %v647_v13 }
 0x125   : > { %v655_v0 = vadd.f32 %v654_v16, %v649_v15 }
 0x127   : > { %656 = vadd.xlane.f32.xlu0 %v655_v0 }
 0x1b4   : > { %v657_v17 = vpop.xlane.xlu0 %656 }
 0x1b5   : > { %v659_v18 = vmul.f32 0.001953125, %v657_v17 }
 0x1b7   : > { %v660_v19 = vsub.f32 %v606_v5, %v659_v18  ;;  %v661_v20 = vsub.f32 %v608_v8, %v659_v18  ;;  %v662_v21 = vsub.f32 %v647_v13, %v659_v18  ;;  %v663_v22 = vsub.f32 %v649_v15, %v659_v18 }
 0x1b8   : > { %v705_v5 = vunpack.c.h.bf16 %v701_v54 }
 0x1b9   : > { %v664_v23 = vmul.f32 %v660_v19, %v660_v19  ;;  %v665_v24 = vmul.f32 %v661_v20, %v661_v20  ;;  %v666_v25 = vmul.f32 %v662_v21, %v662_v21  ;;  %v667_v27 = vmul.f32 %v663_v22, %v663_v22 }
 0x1bb   : > { %v668_v26 = vadd.f32 %v665_v24, %v664_v23 }
 0x1bd   : > { %v669_v28 = vadd.f32 %v668_v26, %v666_v25 }
 0x1bf   : > { %v670_v29 = vadd.f32 %v669_v28, %v667_v27 }
 0x1c1   : > { %671 = vadd.xlane.f32.xlu1 %v670_v29 }
 0x24e   : > { %v672_v30 = vpop.xlane.xlu1 %671 }
 0x24f   : > { %v673_v31 = vmul.f32 0.001953125, %v672_v30 }
 0x251   : > { %v674_v32 = vadd.f32 1e-05, %v673_v31 }
 0x253   : > { %974 = vrsqrt.f32 %v674_v32 }
 0x25d   : > { %v975_v33 = vpop.eup %974 }
 0x25e   : > { %v676_v34 = vmul.f32 %v975_v33, %v660_v19  ;;  %v677_v35 = vmul.f32 %v975_v33, %v661_v20  ;;  %v678_v36 = vmul.f32 %v975_v33, %v662_v21  ;;  %v679_v37 = vmul.f32 %v975_v33, %v663_v22 }
 0x260   : > { %v684_v38 = vmul.f32 0.70710677, %v676_v34  ;;  %v685_v39 = vmul.f32 0.70710677, %v677_v35  ;;  %v686_v40 = vmul.f32 0.70710677, %v678_v36 }
 0x261   : > { %v687_v41 = vmul.f32 0.70710677, %v679_v37  ;;  %v680_v45 = vmul.f32 0.5, %v676_v34  ;;  %v681_v49 = vmul.f32 0.5, %v677_v35  ;;  %v682_v58 = vmul.f32 0.5, %v678_v36 }
 0x262   : > { %976 = verf.f32 %v684_v38  ;;  %v683_v1 = vmul.f32 0.5, %v679_v37 }
 0x263   : > { %978 = verf.f32 %v685_v39 }
 0x264   : > { %980 = verf.f32 %v686_v40 }
 0x265   : > { %982 = verf.f32 %v687_v41 }
 0x26c   : > { %v977_v43 = vpop.eup %976 }
 0x26d   : > { %v979_v44 = vpop.eup %978  ;;  %v692_v46 = vadd.f32 1.0, %v977_v43 }
 0x26e   : > { %v981_v48 = vpop.eup %980  ;;  %v693_v50 = vadd.f32 1.0, %v979_v44 }
 0x26f   : > { %v696_v51 = vmul.f32 %v692_v46, %v680_v45  ;;  %v694_v53 = vadd.f32 1.0, %v981_v48  ;;  %v983_v55 = vpop.eup %982 }
 0x270   : > { %v697_v56 = vmul.f32 %v693_v50, %v681_v49  ;;  %v695_v63 = vadd.f32 1.0, %v983_v55 }
 0x271   : > { %v706_v57 = vadd.f32 %v702_v47, %v696_v51  ;;  %v698_v62 = vmul.f32 %v694_v53, %v682_v58 }
 0x272   : > { %v707_v61 = vadd.f32 %v703_v52, %v697_v56  ;;  %v699_v4 = vmul.f32 %v695_v63, %v683_v1 }
 0x273   : > { %v710_v60 = vmul.f32 0.7072136, %v706_v57  ;;  %v708_v3 = vadd.f32 %v704_v59, %v698_v62 }
 0x274   : > { %v711_v2 = vmul.f32 0.7072136, %v707_v61  ;;  %v709_v7 = vadd.f32 %v705_v5, %v699_v4 }
 0x275   : > { %715 = vrot.lane.b32.xlu1 %v710_v60, %s993_s29  ;;  %v712_v6 = vmul.f32 0.7072136, %v708_v3 }
 0x276   : > { %v713_v8 = vmul.f32 0.7072136, %v709_v7 }
 0x279   : > { %721 = vrot.lane.b32.xlu1 %v711_v2, %s993_s29 }
 0x27d   : > { %727 = vrot.lane.b32.xlu1 %v712_v6, %s993_s29 }
 0x281   : > { %733 = vrot.lane.b32.xlu1 %v713_v8, %s993_s29 }
 0x2e7   : > { %v716_v9 = vpop.permute.xlu1 %715 }
 0x2e8   : > { %v718_v10 = vmax.f32 %v710_v60, %v716_v9 }
 0x2ea   : > { %v719_v11 = vmax.f32 %v718_v10, %v711_v2 }
 0x2eb   : > { %v722_v12 = vpop.permute.xlu1 %721 }
 0x2ec   : > { %v724_v13 = vmax.f32 %v719_v11, %v722_v12 }
 0x2ee   : > { %v725_v14 = vmax.f32 %v724_v13, %v712_v6 }
 0x2ef   : > { %v728_v15 = vpop.permute.xlu1 %727 }
 0x2f0   : > { %v730_v16 = vmax.f32 %v725_v14, %v728_v15 }
 0x2f2   : > { %v731_v0 = vmax.f32 %v730_v16, %v713_v8 }
 0x2f3   : > { %v734_v17 = vpop.permute.xlu1 %733 }
 0x2f4   : > { %v736_v18 = vmax.f32 %v731_v0, %v734_v17 }
 0x2f6   : > { %738 = vst.msk [vmem:[%s215_s7] sm:$0xff] %vm737_vm2, %v736_v18 }
 0x2f7 PF: > { %s14_s15 = sadd.s32 1, %s990_s15  }
 0x2f8   : > { %p11_p4 = scmp.ge.s32.totalorder %s14_s15, 4  }
 0x2fa   :  { %13 = sbr.rel (!%p11_p4) target bundleno = 1 (0x1), region = 69 }

</bundles_post_ra>
